<compile_context>
chip_gen: v7x
topology: tpu7x:2x2x1
jax: 0.10.0
libtpu: 0.0.40
codegen_flags: <defaults>
</compile_context>

<pallas_src>
import numpy as np
import jax
import jax.numpy as jnp
from jax import lax
from jax.experimental import pallas as pl
from jax.experimental.pallas import tpu as pltpu


# ----------------------------- model hyper-params -----------------------------
N_WIDTH = 8
N_ORDER = 3
N_ELEMENTS = 4
N_NODES = N_ELEMENTS * N_ORDER + 1          # 13
N_SAMPLES = 8
X_MIN = 0.0
X_MAX = 1.0
NDIM_IN = 2

JP = NDIM_IN * N_NODES                       # 26 flat basis columns (dim-major, node-minor)
LANES = 128                                  # lane-dense output width
assert JP + N_WIDTH <= LANES

DELTA_X = 0.5 * N_ORDER * (X_MAX - X_MIN) / (N_NODES - 1)
DELTA_X_1ST = DELTA_X
DELTA_X_2ND = DELTA_X ** 2

_NODES = np.linspace(-1.0, 1.0, N_ORDER + 1)   # local Lagrange nodes (python consts)


# ---- trace-time constants: monomial (ascending) coefficients of the local basis ----
def _basis_coefficients():
    P = np.polynomial.polynomial
    phi_c = np.zeros((N_ORDER + 1, N_ORDER + 1))
    for a in range(N_ORDER + 1):
        c = np.array([1.0])
        for m in range(N_ORDER + 1):
            if m != a:
                c = P.polymul(c, np.array([-_NODES[m], 1.0]) / (_NODES[a] - _NODES[m]))
        phi_c[a, :c.shape[0]] = c
    # exact polynomial derivatives; fold the delta_x scaling into the constants
    dphi_c = np.stack([P.polyder(phi_c[a], 1) for a in range(N_ORDER + 1)]) / DELTA_X_1ST
    ddphi_c = np.stack([P.polyder(phi_c[a], 2) for a in range(N_ORDER + 1)]) / DELTA_X_2ND
    return phi_c, dphi_c, ddphi_c


_PHI_C, _DPHI_C, _DDPHI_C = _basis_coefficients()


def _horner(xt, coeffs):
    """Ascending-coefficient polynomial via Horner; coeffs are baked constants."""
    if len(coeffs) == 1:
        return jnp.full_like(xt, float(coeffs[0]))
    acc = float(coeffs[-1])
    for c in coeffs[-2::-1]:
        acc = acc * xt + float(c)
    return acc


# --------------------------------- kernel -------------------------------------
def _lagr_kann_kernel(x_ref, w_ref, out_ref):
    S = x_ref.shape[0]
    x = x_ref[...]                                                   # (S, ndim_in)

    # element / reference-coordinate bookkeeping, all input dims at once
    shift_scale = float(N_NODES - 1) / (X_MAX - X_MIN)
    x_shift = (x - X_MIN) * shift_scale                              # (S, ndim_in)
    # true division (matches reference exactly at element boundaries)
    e = jnp.clip(jnp.floor(x_shift / float(N_ORDER)), 0.0, float(N_ELEMENTS - 1))
    node_l_f = e * float(N_ORDER)                                    # left global node (float, exact int)
    xt = (x_shift - node_l_f) * (2.0 / N_ORDER) - 1.0                # local coord in [-1, 1]
    node_l_i = node_l_f.astype(jnp.int32)                            # (S, ndim_in)

    # local basis values / derivatives via Horner (constants folded, no divides)
    phi_loc = [_horner(xt, _PHI_C[a]) for a in range(N_ORDER + 1)]    # each (S, ndim_in)
    dphi_loc = [_horner(xt, _DPHI_C[a]) for a in range(N_ORDER + 1)]
    ddphi_loc = [_horner(xt, _DDPHI_C[a]) for a in range(N_ORDER + 1)]

    # scatter directly into the 128-lane slab: column = j*N_NODES + node_l + a
    # (columns per (j, a) are disjoint -> select-accumulate, no mul/add/cast)
    col_iota = lax.broadcasted_iota(jnp.int32, (S, LANES), 1)
    phi_f = jnp.zeros((S, LANES), jnp.float32)
    dphi_f = jnp.zeros((S, LANES), jnp.float32)
    ddphi_f = jnp.zeros((S, LANES), jnp.float32)
    for j in range(NDIM_IN):
        nl_j = node_l_i[:, j:j + 1]                                   # (S, 1) int32
        for a in range(N_ORDER + 1):
            hit = col_iota == nl_j + (j * N_NODES + a)                # (S, LANES) bool
            phi_f = jnp.where(hit, phi_loc[a][:, j:j + 1], phi_f)
            dphi_f = jnp.where(hit, dphi_loc[a][:, j:j + 1], dphi_f)
            ddphi_f = jnp.where(hit, ddphi_loc[a][:, j:j + 1], ddphi_f)

    # stack along sublanes by storing row slices directly (no concatenate)
    out_ref[0:S, :] = phi_f
    out_ref[S:2 * S, :] = dphi_f
    out_ref[2 * S:3 * S, :] = ddphi_f

    # one fused MXU matmul; w_ref is zero except rows 0..JP-1 / cols JP..JP+NW-1,
    # so the result lands in columns JP.. without any lane shift.  Basis columns
    # >= JP are zero, hence a plain add composes the combined lane-dense output.
    basis = out_ref[...]                                              # (3S, LANES)
    out_ref[...] = basis + jnp.dot(basis, w_ref[...],
                                   preferred_element_type=jnp.float32)


# --------------------------------- wrappers ------------------------------------
def prepare_weight(weight):
    """Hoisted out of the per-call path: call once per weight update.

    weight: (n_width, n_nodes, ndim_in) f32.
    Returns a zero-padded (LANES, LANES) matrix with
      w_big[j*n_nodes + p, JP + k] = weight[k, p, j].
    """
    w_flat = jnp.transpose(weight.astype(jnp.float32), (2, 1, 0)).reshape(JP, N_WIDTH)
    w_big = jnp.zeros((LANES, LANES), jnp.float32)
    return w_big.at[0:JP, JP:JP + N_WIDTH].set(w_flat)


def _forward(x, w_big):
    """x: (n_samples, ndim_in) f32, w_big: (LANES, LANES) f32 from prepare_weight."""
    S, J = x.shape
    assert J == NDIM_IN and S == N_SAMPLES

    vmem = pl.BlockSpec(memory_space=pltpu.MemorySpace.VMEM)

    # TODO(synk): for batched / multi-layer use, add a grid over sample tiles
    # (>=512 rows per tile) with dimension_semantics=("parallel",) for v7x.
    out = pl.pallas_call(
        _lagr_kann_kernel,
        out_shape=jax.ShapeDtypeStruct((3 * S, LANES), jnp.float32),
        in_specs=[vmem, vmem],
        out_specs=vmem,
    )(x.astype(jnp.float32), w_big)

    basis = out[:, 0:JP]                       # rows: [phi; dphi; ddphi] flat
    res = out[:, JP:JP + N_WIDTH]              # rows: [t; dt; ddt]
    t, dt, ddt = res[:S], res[S:2 * S], res[2 * S:]

    def expand(flat):
        # (S, ndim*n_nodes) -> (S, n_nodes, ndim); broadcast over width only to
        # reproduce the module's output signature (consumers that can fuse
        # should take the compact form instead).
        a = flat.reshape(S, NDIM_IN, N_NODES).transpose(0, 2, 1)
        return jnp.broadcast_to(a[:, None, :, :], (S, N_WIDTH, N_NODES, NDIM_IN))

    return {
        't_ik': t, 'dt_ik': dt, 'ddt_ik': ddt,
        'phi_ikp': expand(basis[:S]),
        'dphi_ikp': expand(basis[S:2 * S]),
        'ddphi_ikp': expand(basis[2 * S:]),
        'delta_x': DELTA_X,
    }


_forward_jit = jax.jit(_forward)


def lagr_kann_auto_inner(x, weight):
    """Convenience entry point: flattens the weight (normally cached) and runs."""
    return _forward_jit(x, prepare_weight(weight))


# ------------------------------ numpy reference --------------------------------
def _ref_forward(x, w):
    S, J = x.shape
    nodes = _NODES
    x_shift = (N_NODES - 1) * (x - X_MIN) / (X_MAX - X_MIN)
    e = np.clip(np.floor(x_shift / N_ORDER), 0, N_ELEMENTS - 1)
    node_l = (e * N_ORDER).astype(np.int64)
    xt = 2.0 * (x_shift - node_l) / N_ORDER - 1.0
    phi_l = np.zeros((S, N_ORDER + 1, J))
    dphi_l = np.zeros_like(phi_l)
    ddphi_l = np.zeros_like(phi_l)
    for a in range(N_ORDER + 1):
        p = np.ones_like(xt)
        for m in range(N_ORDER + 1):
            if m != a:
                p *= (xt - nodes[m]) / (nodes[a] - nodes[m])
        phi_l[:, a, :] = p
        y = np.zeros_like(xt)
        for i in range(N_ORDER + 1):
            if i != a:
                k = np.ones_like(xt) / (nodes[a] - nodes[i])
                for m in range(N_ORDER + 1):
                    if m != i and m != a:
                        k *= (xt - nodes[m]) / (nodes[a] - nodes[m])
                y += k
        dphi_l[:, a, :] = y
        y2 = np.zeros_like(xt)
        for i in range(N_ORDER + 1):
            if i != a:
                ks = np.zeros_like(xt)
                for m in range(N_ORDER + 1):
                    if m != i and m != a:
                        kp = np.ones_like(xt) / (nodes[a] - nodes[m])
                        for n in range(N_ORDER + 1):
                            if n != i and n != a and n != m:
                                kp *= (xt - nodes[n]) / (nodes[a] - nodes[n])
                        ks += kp
                y2 += ks / (nodes[a] - nodes[i])
        ddphi_l[:, a, :] = y2
    phi = np.zeros((S, N_WIDTH, N_NODES, J))
    dphi = np.zeros_like(phi)
    ddphi = np.zeros_like(phi)
    for i in range(S):
        for j in range(J):
            for a in range(N_ORDER + 1):
                phi[i, :, node_l[i, j] + a, j] = phi_l[i, a, j]
                dphi[i, :, node_l[i, j] + a, j] = dphi_l[i, a, j] / DELTA_X_1ST
                ddphi[i, :, node_l[i, j] + a, j] = ddphi_l[i, a, j] / DELTA_X_2ND
    t = np.einsum('kpj,ikpj->ik', w, phi)
    dt = np.einsum('kpj,ikpj->ik', w, dphi)
    ddt = np.einsum('kpj,ikpj->ik', w, ddphi)
    return t, dt, ddt, phi, dphi, ddphi


# ----------------------------------- main --------------------------------------
if __name__ == "__main__":
    key = jax.random.PRNGKey(0)
    kx, kw = jax.random.split(key)

    x = jax.random.uniform(kx, (N_SAMPLES, NDIM_IN), dtype=jnp.float32,
                           minval=X_MIN, maxval=X_MAX)
    # NOTE: the PyTorch module initializes weight to zeros; we use small random
    # values (deterministic) so the einsum path is exercised non-trivially.
    weight = 0.1 * jax.random.normal(kw, (N_WIDTH, N_NODES, NDIM_IN), dtype=jnp.float32)

    # weight flattening is hoisted (would be cached per weight update)
    w_big = prepare_weight(weight)
    out = _forward_jit(x, w_big)
    jax.block_until_ready(out)

    # correctness check against a pure-numpy reference of the torch forward
    t_r, dt_r, ddt_r, phi_r, dphi_r, ddphi_r = _ref_forward(
        np.asarray(x, dtype=np.float64), np.asarray(weight, dtype=np.float64))

    ok = True
    ok &= np.allclose(np.asarray(out['t_ik']), t_r, rtol=1e-3, atol=1e-3)
    ok &= np.allclose(np.asarray(out['dt_ik']), dt_r, rtol=1e-3, atol=1e-2)
    ok &= np.allclose(np.asarray(out['ddt_ik']), ddt_r, rtol=1e-3, atol=1e-1)
    ok &= np.allclose(np.asarray(out['phi_ikp']), phi_r, rtol=1e-3, atol=1e-4)
    ok &= np.allclose(np.asarray(out['dphi_ikp']), dphi_r, rtol=1e-3, atol=1e-3)
    ok &= np.allclose(np.asarray(out['ddphi_ikp']), ddphi_r, rtol=1e-3, atol=1e-1)
    ok &= np.isclose(out['delta_x'], DELTA_X)

    if ok:
        print("KERNEL_OK")
    else:
        raise SystemExit("mismatch vs reference")
</pallas_src>

<mosaic_0001>
module attributes {stable_mosaic.version = 11 : i64} {
  func.func @_lagr_kann_kernel(%arg0: memref<8x2xf32, #tpu.memory_space<vmem>>, %arg1: memref<128x128xf32, #tpu.memory_space<vmem>>, %arg2: memref<24x128xf32, #tpu.memory_space<vmem>>) attributes {dimension_semantics = [], scalar_prefetch = 0 : i64, scratch_operands = 0 : i64, tpu.core_type = #tpu.core_type<tc>} {
    %c0 = arith.constant 0 : index
    %c0_0 = arith.constant 0 : index
    %0 = vector.load %arg0[%c0, %c0_0] : memref<8x2xf32, #tpu.memory_space<vmem>>, vector<8x2xf32>
    %cst = arith.constant 0.000000e+00 : f32
    %1 = vector.broadcast %cst : f32 to vector<8x2xf32>
    %2 = arith.subf %0, %1 : vector<8x2xf32>
    %cst_1 = arith.constant 1.200000e+01 : f32
    %3 = vector.broadcast %cst_1 : f32 to vector<8x2xf32>
    %4 = arith.mulf %2, %3 : vector<8x2xf32>
    %cst_2 = arith.constant 3.000000e+00 : f32
    %5 = vector.broadcast %cst_2 : f32 to vector<8x2xf32>
    %6 = arith.divf %4, %5 : vector<8x2xf32>
    %7 = math.floor %6 : vector<8x2xf32>
    %cst_3 = arith.constant 0.000000e+00 : f32
    %cst_4 = arith.constant 3.000000e+00 : f32
    %8 = vector.broadcast %cst_3 : f32 to vector<8x2xf32>
    %9 = arith.maximumf %8, %7 : vector<8x2xf32>
    %10 = vector.broadcast %cst_4 : f32 to vector<8x2xf32>
    %11 = arith.minimumf %10, %9 : vector<8x2xf32>
    %cst_5 = arith.constant 3.000000e+00 : f32
    %12 = vector.broadcast %cst_5 : f32 to vector<8x2xf32>
    %13 = arith.mulf %11, %12 : vector<8x2xf32>
    %14 = arith.subf %4, %13 : vector<8x2xf32>
    %cst_6 = arith.constant 0.666666686 : f32
    %15 = vector.broadcast %cst_6 : f32 to vector<8x2xf32>
    %16 = arith.mulf %14, %15 : vector<8x2xf32>
    %cst_7 = arith.constant 1.000000e+00 : f32
    %17 = vector.broadcast %cst_7 : f32 to vector<8x2xf32>
    %18 = arith.subf %16, %17 : vector<8x2xf32>
    %19 = arith.fptosi %13 : vector<8x2xf32> to vector<8x2xi32>
    %cst_8 = arith.constant -5.625000e-01 : f32
    %20 = vector.broadcast %cst_8 : f32 to vector<8x2xf32>
    %21 = arith.mulf %20, %18 : vector<8x2xf32>
    %cst_9 = arith.constant 5.625000e-01 : f32
    %22 = vector.broadcast %cst_9 : f32 to vector<8x2xf32>
    %23 = arith.addf %21, %22 : vector<8x2xf32>
    %24 = arith.mulf %23, %18 : vector<8x2xf32>
    %cst_10 = arith.constant 6.250000e-02 : f32
    %25 = vector.broadcast %cst_10 : f32 to vector<8x2xf32>
    %26 = arith.addf %24, %25 : vector<8x2xf32>
    %27 = arith.mulf %26, %18 : vector<8x2xf32>
    %cst_11 = arith.constant -6.250000e-02 : f32
    %28 = vector.broadcast %cst_11 : f32 to vector<8x2xf32>
    %29 = arith.addf %27, %28 : vector<8x2xf32>
    %cst_12 = arith.constant 1.687500e+00 : f32
    %30 = vector.broadcast %cst_12 : f32 to vector<8x2xf32>
    %31 = arith.mulf %30, %18 : vector<8x2xf32>
    %cst_13 = arith.constant -5.625000e-01 : f32
    %32 = vector.broadcast %cst_13 : f32 to vector<8x2xf32>
    %33 = arith.addf %31, %32 : vector<8x2xf32>
    %34 = arith.mulf %33, %18 : vector<8x2xf32>
    %cst_14 = arith.constant -1.687500e+00 : f32
    %35 = vector.broadcast %cst_14 : f32 to vector<8x2xf32>
    %36 = arith.addf %34, %35 : vector<8x2xf32>
    %37 = arith.mulf %36, %18 : vector<8x2xf32>
    %cst_15 = arith.constant 5.625000e-01 : f32
    %38 = vector.broadcast %cst_15 : f32 to vector<8x2xf32>
    %39 = arith.addf %37, %38 : vector<8x2xf32>
    %cst_16 = arith.constant -1.687500e+00 : f32
    %40 = vector.broadcast %cst_16 : f32 to vector<8x2xf32>
    %41 = arith.mulf %40, %18 : vector<8x2xf32>
    %cst_17 = arith.constant -5.625000e-01 : f32
    %42 = vector.broadcast %cst_17 : f32 to vector<8x2xf32>
    %43 = arith.addf %41, %42 : vector<8x2xf32>
    %44 = arith.mulf %43, %18 : vector<8x2xf32>
    %cst_18 = arith.constant 1.687500e+00 : f32
    %45 = vector.broadcast %cst_18 : f32 to vector<8x2xf32>
    %46 = arith.addf %44, %45 : vector<8x2xf32>
    %47 = arith.mulf %46, %18 : vector<8x2xf32>
    %cst_19 = arith.constant 5.625000e-01 : f32
    %48 = vector.broadcast %cst_19 : f32 to vector<8x2xf32>
    %49 = arith.addf %47, %48 : vector<8x2xf32>
    %cst_20 = arith.constant 5.625000e-01 : f32
    %50 = vector.broadcast %cst_20 : f32 to vector<8x2xf32>
    %51 = arith.mulf %50, %18 : vector<8x2xf32>
    %cst_21 = arith.constant 5.625000e-01 : f32
    %52 = vector.broadcast %cst_21 : f32 to vector<8x2xf32>
    %53 = arith.addf %51, %52 : vector<8x2xf32>
    %54 = arith.mulf %53, %18 : vector<8x2xf32>
    %cst_22 = arith.constant -6.250000e-02 : f32
    %55 = vector.broadcast %cst_22 : f32 to vector<8x2xf32>
    %56 = arith.addf %54, %55 : vector<8x2xf32>
    %57 = arith.mulf %56, %18 : vector<8x2xf32>
    %cst_23 = arith.constant -6.250000e-02 : f32
    %58 = vector.broadcast %cst_23 : f32 to vector<8x2xf32>
    %59 = arith.addf %57, %58 : vector<8x2xf32>
    %cst_24 = arith.constant -1.350000e+01 : f32
    %60 = vector.broadcast %cst_24 : f32 to vector<8x2xf32>
    %61 = arith.mulf %60, %18 : vector<8x2xf32>
    %cst_25 = arith.constant 9.000000e+00 : f32
    %62 = vector.broadcast %cst_25 : f32 to vector<8x2xf32>
    %63 = arith.addf %61, %62 : vector<8x2xf32>
    %64 = arith.mulf %63, %18 : vector<8x2xf32>
    %cst_26 = arith.constant 5.000000e-01 : f32
    %65 = vector.broadcast %cst_26 : f32 to vector<8x2xf32>
    %66 = arith.addf %64, %65 : vector<8x2xf32>
    %cst_27 = arith.constant 4.050000e+01 : f32
    %67 = vector.broadcast %cst_27 : f32 to vector<8x2xf32>
    %68 = arith.mulf %67, %18 : vector<8x2xf32>
    %cst_28 = arith.constant -9.000000e+00 : f32
    %69 = vector.broadcast %cst_28 : f32 to vector<8x2xf32>
    %70 = arith.addf %68, %69 : vector<8x2xf32>
    %71 = arith.mulf %70, %18 : vector<8x2xf32>
    %cst_29 = arith.constant -1.350000e+01 : f32
    %72 = vector.broadcast %cst_29 : f32 to vector<8x2xf32>
    %73 = arith.addf %71, %72 : vector<8x2xf32>
    %cst_30 = arith.constant -4.050000e+01 : f32
    %74 = vector.broadcast %cst_30 : f32 to vector<8x2xf32>
    %75 = arith.mulf %74, %18 : vector<8x2xf32>
    %cst_31 = arith.constant -9.000000e+00 : f32
    %76 = vector.broadcast %cst_31 : f32 to vector<8x2xf32>
    %77 = arith.addf %75, %76 : vector<8x2xf32>
    %78 = arith.mulf %77, %18 : vector<8x2xf32>
    %cst_32 = arith.constant 1.350000e+01 : f32
    %79 = vector.broadcast %cst_32 : f32 to vector<8x2xf32>
    %80 = arith.addf %78, %79 : vector<8x2xf32>
    %cst_33 = arith.constant 1.350000e+01 : f32
    %81 = vector.broadcast %cst_33 : f32 to vector<8x2xf32>
    %82 = arith.mulf %81, %18 : vector<8x2xf32>
    %cst_34 = arith.constant 9.000000e+00 : f32
    %83 = vector.broadcast %cst_34 : f32 to vector<8x2xf32>
    %84 = arith.addf %82, %83 : vector<8x2xf32>
    %85 = arith.mulf %84, %18 : vector<8x2xf32>
    %cst_35 = arith.constant -5.000000e-01 : f32
    %86 = vector.broadcast %cst_35 : f32 to vector<8x2xf32>
    %87 = arith.addf %85, %86 : vector<8x2xf32>
    %cst_36 = arith.constant -2.160000e+02 : f32
    %88 = vector.broadcast %cst_36 : f32 to vector<8x2xf32>
    %89 = arith.mulf %88, %18 : vector<8x2xf32>
    %cst_37 = arith.constant 7.200000e+01 : f32
    %90 = vector.broadcast %cst_37 : f32 to vector<8x2xf32>
    %91 = arith.addf %89, %90 : vector<8x2xf32>
    %cst_38 = arith.constant 6.480000e+02 : f32
    %92 = vector.broadcast %cst_38 : f32 to vector<8x2xf32>
    %93 = arith.mulf %92, %18 : vector<8x2xf32>
    %cst_39 = arith.constant -7.200000e+01 : f32
    %94 = vector.broadcast %cst_39 : f32 to vector<8x2xf32>
    %95 = arith.addf %93, %94 : vector<8x2xf32>
    %cst_40 = arith.constant -6.480000e+02 : f32
    %96 = vector.broadcast %cst_40 : f32 to vector<8x2xf32>
    %97 = arith.mulf %96, %18 : vector<8x2xf32>
    %cst_41 = arith.constant -7.200000e+01 : f32
    %98 = vector.broadcast %cst_41 : f32 to vector<8x2xf32>
    %99 = arith.addf %97, %98 : vector<8x2xf32>
    %cst_42 = arith.constant 2.160000e+02 : f32
    %100 = vector.broadcast %cst_42 : f32 to vector<8x2xf32>
    %101 = arith.mulf %100, %18 : vector<8x2xf32>
    %cst_43 = arith.constant 7.200000e+01 : f32
    %102 = vector.broadcast %cst_43 : f32 to vector<8x2xf32>
    %103 = arith.addf %101, %102 : vector<8x2xf32>
    %104 = tpu.iota {dimensions = array<i32: 1>} : vector<8x128xi32>
    %cst_44 = arith.constant 0.000000e+00 : f32
    %105 = vector.broadcast %cst_44 : f32 to vector<8x128xf32>
    %cst_45 = arith.constant 0.000000e+00 : f32
    %106 = vector.broadcast %cst_45 : f32 to vector<8x128xf32>
    %cst_46 = arith.constant 0.000000e+00 : f32
    %107 = vector.broadcast %cst_46 : f32 to vector<8x128xf32>
    %108 = vector.extract_strided_slice %19 {offsets = [0, 0], sizes = [8, 1], strides = [1, 1]} : vector<8x2xi32> to vector<8x1xi32>
    %c0_i32 = arith.constant 0 : i32
    %109 = vector.broadcast %c0_i32 : i32 to vector<8x1xi32>
    %110 = arith.addi %108, %109 : vector<8x1xi32>
    %111 = vector.broadcast %110 : vector<8x1xi32> to vector<8x128xi32>
    %112 = arith.cmpi eq, %104, %111 : vector<8x128xi32>
    %113 = vector.extract_strided_slice %29 {offsets = [0, 0], sizes = [8, 1], strides = [1, 1]} : vector<8x2xf32> to vector<8x1xf32>
    %114 = vector.shape_cast %113 : vector<8x1xf32> to vector<8x1xf32>
    %115 = vector.broadcast %114 : vector<8x1xf32> to vector<8x128xf32>
    %116 = arith.select %112, %115, %105 : vector<8x128xi1>, vector<8x128xf32>
    %117 = vector.extract_strided_slice %66 {offsets = [0, 0], sizes = [8, 1], strides = [1, 1]} : vector<8x2xf32> to vector<8x1xf32>
    %118 = vector.shape_cast %117 : vector<8x1xf32> to vector<8x1xf32>
    %119 = vector.broadcast %118 : vector<8x1xf32> to vector<8x128xf32>
    %120 = arith.select %112, %119, %106 : vector<8x128xi1>, vector<8x128xf32>
    %121 = vector.extract_strided_slice %91 {offsets = [0, 0], sizes = [8, 1], strides = [1, 1]} : vector<8x2xf32> to vector<8x1xf32>
    %122 = vector.shape_cast %121 : vector<8x1xf32> to vector<8x1xf32>
    %123 = vector.broadcast %122 : vector<8x1xf32> to vector<8x128xf32>
    %124 = arith.select %112, %123, %107 : vector<8x128xi1>, vector<8x128xf32>
    %c1_i32 = arith.constant 1 : i32
    %125 = vector.broadcast %c1_i32 : i32 to vector<8x1xi32>
    %126 = arith.addi %108, %125 : vector<8x1xi32>
    %127 = vector.broadcast %126 : vector<8x1xi32> to vector<8x128xi32>
    %128 = arith.cmpi eq, %104, %127 : vector<8x128xi32>
    %129 = vector.extract_strided_slice %39 {offsets = [0, 0], sizes = [8, 1], strides = [1, 1]} : vector<8x2xf32> to vector<8x1xf32>
    %130 = vector.shape_cast %129 : vector<8x1xf32> to vector<8x1xf32>
    %131 = vector.broadcast %130 : vector<8x1xf32> to vector<8x128xf32>
    %132 = arith.select %128, %131, %116 : vector<8x128xi1>, vector<8x128xf32>
    %133 = vector.extract_strided_slice %73 {offsets = [0, 0], sizes = [8, 1], strides = [1, 1]} : vector<8x2xf32> to vector<8x1xf32>
    %134 = vector.shape_cast %133 : vector<8x1xf32> to vector<8x1xf32>
    %135 = vector.broadcast %134 : vector<8x1xf32> to vector<8x128xf32>
    %136 = arith.select %128, %135, %120 : vector<8x128xi1>, vector<8x128xf32>
    %137 = vector.extract_strided_slice %95 {offsets = [0, 0], sizes = [8, 1], strides = [1, 1]} : vector<8x2xf32> to vector<8x1xf32>
    %138 = vector.shape_cast %137 : vector<8x1xf32> to vector<8x1xf32>
    %139 = vector.broadcast %138 : vector<8x1xf32> to vector<8x128xf32>
    %140 = arith.select %128, %139, %124 : vector<8x128xi1>, vector<8x128xf32>
    %c2_i32 = arith.constant 2 : i32
    %141 = vector.broadcast %c2_i32 : i32 to vector<8x1xi32>
    %142 = arith.addi %108, %141 : vector<8x1xi32>
    %143 = vector.broadcast %142 : vector<8x1xi32> to vector<8x128xi32>
    %144 = arith.cmpi eq, %104, %143 : vector<8x128xi32>
    %145 = vector.extract_strided_slice %49 {offsets = [0, 0], sizes = [8, 1], strides = [1, 1]} : vector<8x2xf32> to vector<8x1xf32>
    %146 = vector.shape_cast %145 : vector<8x1xf32> to vector<8x1xf32>
    %147 = vector.broadcast %146 : vector<8x1xf32> to vector<8x128xf32>
    %148 = arith.select %144, %147, %132 : vector<8x128xi1>, vector<8x128xf32>
    %149 = vector.extract_strided_slice %80 {offsets = [0, 0], sizes = [8, 1], strides = [1, 1]} : vector<8x2xf32> to vector<8x1xf32>
    %150 = vector.shape_cast %149 : vector<8x1xf32> to vector<8x1xf32>
    %151 = vector.broadcast %150 : vector<8x1xf32> to vector<8x128xf32>
    %152 = arith.select %144, %151, %136 : vector<8x128xi1>, vector<8x128xf32>
    %153 = vector.extract_strided_slice %99 {offsets = [0, 0], sizes = [8, 1], strides = [1, 1]} : vector<8x2xf32> to vector<8x1xf32>
    %154 = vector.shape_cast %153 : vector<8x1xf32> to vector<8x1xf32>
    %155 = vector.broadcast %154 : vector<8x1xf32> to vector<8x128xf32>
    %156 = arith.select %144, %155, %140 : vector<8x128xi1>, vector<8x128xf32>
    %c3_i32 = arith.constant 3 : i32
    %157 = vector.broadcast %c3_i32 : i32 to vector<8x1xi32>
    %158 = arith.addi %108, %157 : vector<8x1xi32>
    %159 = vector.broadcast %158 : vector<8x1xi32> to vector<8x128xi32>
    %160 = arith.cmpi eq, %104, %159 : vector<8x128xi32>
    %161 = vector.extract_strided_slice %59 {offsets = [0, 0], sizes = [8, 1], strides = [1, 1]} : vector<8x2xf32> to vector<8x1xf32>
    %162 = vector.shape_cast %161 : vector<8x1xf32> to vector<8x1xf32>
    %163 = vector.broadcast %162 : vector<8x1xf32> to vector<8x128xf32>
    %164 = arith.select %160, %163, %148 : vector<8x128xi1>, vector<8x128xf32>
    %165 = vector.extract_strided_slice %87 {offsets = [0, 0], sizes = [8, 1], strides = [1, 1]} : vector<8x2xf32> to vector<8x1xf32>
    %166 = vector.shape_cast %165 : vector<8x1xf32> to vector<8x1xf32>
    %167 = vector.broadcast %166 : vector<8x1xf32> to vector<8x128xf32>
    %168 = arith.select %160, %167, %152 : vector<8x128xi1>, vector<8x128xf32>
    %169 = vector.extract_strided_slice %103 {offsets = [0, 0], sizes = [8, 1], strides = [1, 1]} : vector<8x2xf32> to vector<8x1xf32>
    %170 = vector.shape_cast %169 : vector<8x1xf32> to vector<8x1xf32>
    %171 = vector.broadcast %170 : vector<8x1xf32> to vector<8x128xf32>
    %172 = arith.select %160, %171, %156 : vector<8x128xi1>, vector<8x128xf32>
    %173 = vector.extract_strided_slice %19 {offsets = [0, 1], sizes = [8, 1], strides = [1, 1]} : vector<8x2xi32> to vector<8x1xi32>
    %c13_i32 = arith.constant 13 : i32
    %174 = vector.broadcast %c13_i32 : i32 to vector<8x1xi32>
    %175 = arith.addi %173, %174 : vector<8x1xi32>
    %176 = vector.broadcast %175 : vector<8x1xi32> to vector<8x128xi32>
    %177 = arith.cmpi eq, %104, %176 : vector<8x128xi32>
    %178 = vector.extract_strided_slice %29 {offsets = [0, 1], sizes = [8, 1], strides = [1, 1]} : vector<8x2xf32> to vector<8x1xf32>
    %179 = vector.shape_cast %178 : vector<8x1xf32> to vector<8x1xf32>
    %180 = vector.broadcast %179 : vector<8x1xf32> to vector<8x128xf32>
    %181 = arith.select %177, %180, %164 : vector<8x128xi1>, vector<8x128xf32>
    %182 = vector.extract_strided_slice %66 {offsets = [0, 1], sizes = [8, 1], strides = [1, 1]} : vector<8x2xf32> to vector<8x1xf32>
    %183 = vector.shape_cast %182 : vector<8x1xf32> to vector<8x1xf32>
    %184 = vector.broadcast %183 : vector<8x1xf32> to vector<8x128xf32>
    %185 = arith.select %177, %184, %168 : vector<8x128xi1>, vector<8x128xf32>
    %186 = vector.extract_strided_slice %91 {offsets = [0, 1], sizes = [8, 1], strides = [1, 1]} : vector<8x2xf32> to vector<8x1xf32>
    %187 = vector.shape_cast %186 : vector<8x1xf32> to vector<8x1xf32>
    %188 = vector.broadcast %187 : vector<8x1xf32> to vector<8x128xf32>
    %189 = arith.select %177, %188, %172 : vector<8x128xi1>, vector<8x128xf32>
    %c14_i32 = arith.constant 14 : i32
    %190 = vector.broadcast %c14_i32 : i32 to vector<8x1xi32>
    %191 = arith.addi %173, %190 : vector<8x1xi32>
    %192 = vector.broadcast %191 : vector<8x1xi32> to vector<8x128xi32>
    %193 = arith.cmpi eq, %104, %192 : vector<8x128xi32>
    %194 = vector.extract_strided_slice %39 {offsets = [0, 1], sizes = [8, 1], strides = [1, 1]} : vector<8x2xf32> to vector<8x1xf32>
    %195 = vector.shape_cast %194 : vector<8x1xf32> to vector<8x1xf32>
    %196 = vector.broadcast %195 : vector<8x1xf32> to vector<8x128xf32>
    %197 = arith.select %193, %196, %181 : vector<8x128xi1>, vector<8x128xf32>
    %198 = vector.extract_strided_slice %73 {offsets = [0, 1], sizes = [8, 1], strides = [1, 1]} : vector<8x2xf32> to vector<8x1xf32>
    %199 = vector.shape_cast %198 : vector<8x1xf32> to vector<8x1xf32>
    %200 = vector.broadcast %199 : vector<8x1xf32> to vector<8x128xf32>
    %201 = arith.select %193, %200, %185 : vector<8x128xi1>, vector<8x128xf32>
    %202 = vector.extract_strided_slice %95 {offsets = [0, 1], sizes = [8, 1], strides = [1, 1]} : vector<8x2xf32> to vector<8x1xf32>
    %203 = vector.shape_cast %202 : vector<8x1xf32> to vector<8x1xf32>
    %204 = vector.broadcast %203 : vector<8x1xf32> to vector<8x128xf32>
    %205 = arith.select %193, %204, %189 : vector<8x128xi1>, vector<8x128xf32>
    %c15_i32 = arith.constant 15 : i32
    %206 = vector.broadcast %c15_i32 : i32 to vector<8x1xi32>
    %207 = arith.addi %173, %206 : vector<8x1xi32>
    %208 = vector.broadcast %207 : vector<8x1xi32> to vector<8x128xi32>
    %209 = arith.cmpi eq, %104, %208 : vector<8x128xi32>
    %210 = vector.extract_strided_slice %49 {offsets = [0, 1], sizes = [8, 1], strides = [1, 1]} : vector<8x2xf32> to vector<8x1xf32>
    %211 = vector.shape_cast %210 : vector<8x1xf32> to vector<8x1xf32>
    %212 = vector.broadcast %211 : vector<8x1xf32> to vector<8x128xf32>
    %213 = arith.select %209, %212, %197 : vector<8x128xi1>, vector<8x128xf32>
    %214 = vector.extract_strided_slice %80 {offsets = [0, 1], sizes = [8, 1], strides = [1, 1]} : vector<8x2xf32> to vector<8x1xf32>
    %215 = vector.shape_cast %214 : vector<8x1xf32> to vector<8x1xf32>
    %216 = vector.broadcast %215 : vector<8x1xf32> to vector<8x128xf32>
    %217 = arith.select %209, %216, %201 : vector<8x128xi1>, vector<8x128xf32>
    %218 = vector.extract_strided_slice %99 {offsets = [0, 1], sizes = [8, 1], strides = [1, 1]} : vector<8x2xf32> to vector<8x1xf32>
    %219 = vector.shape_cast %218 : vector<8x1xf32> to vector<8x1xf32>
    %220 = vector.broadcast %219 : vector<8x1xf32> to vector<8x128xf32>
    %221 = arith.select %209, %220, %205 : vector<8x128xi1>, vector<8x128xf32>
    %c16_i32 = arith.constant 16 : i32
    %222 = vector.broadcast %c16_i32 : i32 to vector<8x1xi32>
    %223 = arith.addi %173, %222 : vector<8x1xi32>
    %224 = vector.broadcast %223 : vector<8x1xi32> to vector<8x128xi32>
    %225 = arith.cmpi eq, %104, %224 : vector<8x128xi32>
    %226 = vector.extract_strided_slice %59 {offsets = [0, 1], sizes = [8, 1], strides = [1, 1]} : vector<8x2xf32> to vector<8x1xf32>
    %227 = vector.shape_cast %226 : vector<8x1xf32> to vector<8x1xf32>
    %228 = vector.broadcast %227 : vector<8x1xf32> to vector<8x128xf32>
    %229 = arith.select %225, %228, %213 : vector<8x128xi1>, vector<8x128xf32>
    %230 = vector.extract_strided_slice %87 {offsets = [0, 1], sizes = [8, 1], strides = [1, 1]} : vector<8x2xf32> to vector<8x1xf32>
    %231 = vector.shape_cast %230 : vector<8x1xf32> to vector<8x1xf32>
    %232 = vector.broadcast %231 : vector<8x1xf32> to vector<8x128xf32>
    %233 = arith.select %225, %232, %217 : vector<8x128xi1>, vector<8x128xf32>
    %234 = vector.extract_strided_slice %103 {offsets = [0, 1], sizes = [8, 1], strides = [1, 1]} : vector<8x2xf32> to vector<8x1xf32>
    %235 = vector.shape_cast %234 : vector<8x1xf32> to vector<8x1xf32>
    %236 = vector.broadcast %235 : vector<8x1xf32> to vector<8x128xf32>
    %237 = arith.select %225, %236, %221 : vector<8x128xi1>, vector<8x128xf32>
    %c0_47 = arith.constant 0 : index
    %c0_48 = arith.constant 0 : index
    %238 = vector.load %arg2[%c0_47, %c0_48] : memref<24x128xf32, #tpu.memory_space<vmem>>, vector<8x128xf32>
    tpu.vector_store %arg2[%c0_47, %c0_48], %229 {strides = array<i32>} : memref<24x128xf32, #tpu.memory_space<vmem>>, vector<8x128xf32>,
    %c8 = arith.constant 8 : index
    %c0_49 = arith.constant 0 : index
    %239 = vector.load %arg2[%c8, %c0_49] : memref<24x128xf32, #tpu.memory_space<vmem>>, vector<8x128xf32>
    tpu.vector_store %arg2[%c8, %c0_49], %233 {strides = array<i32>} : memref<24x128xf32, #tpu.memory_space<vmem>>, vector<8x128xf32>,
    %c16 = arith.constant 16 : index
    %c0_50 = arith.constant 0 : index
    %240 = vector.load %arg2[%c16, %c0_50] : memref<24x128xf32, #tpu.memory_space<vmem>>, vector<8x128xf32>
    tpu.vector_store %arg2[%c16, %c0_50], %237 {strides = array<i32>} : memref<24x128xf32, #tpu.memory_space<vmem>>, vector<8x128xf32>,
    %c0_51 = arith.constant 0 : index
    %c0_52 = arith.constant 0 : index
    %241 = vector.load %arg2[%c0_51, %c0_52] : memref<24x128xf32, #tpu.memory_space<vmem>>, vector<24x128xf32>
    %c0_53 = arith.constant 0 : index
    %c0_54 = arith.constant 0 : index
    %242 = vector.load %arg1[%c0_53, %c0_54] : memref<128x128xf32, #tpu.memory_space<vmem>>, vector<128x128xf32>
    %cst_55 = arith.constant dense<0.000000e+00> : vector<24x128xf32>
    %243 = tpu.matmul %241, %242, %cst_55 {dimension_numbers = #tpu.dot_dimension_numbers<[1], [0], [0], [1], [0, 0, 1, 1], [], []>} : vector<24x128xf32>, vector<128x128xf32>, vector<24x128xf32> -> vector<24x128xf32>
    %244 = arith.addf %241, %243 : vector<24x128xf32>
    %c0_56 = arith.constant 0 : index
    %c0_57 = arith.constant 0 : index
    %245 = vector.load %arg2[%c0_56, %c0_57] : memref<24x128xf32, #tpu.memory_space<vmem>>, vector<24x128xf32>
    tpu.vector_store %arg2[%c0_56, %c0_57], %244 {strides = array<i32>} : memref<24x128xf32, #tpu.memory_space<vmem>>, vector<24x128xf32>,
    return
  }
}

</mosaic_0001>

<bundles_post_ra>
// kernel: _forward.1
= control target key start
LH: loop header
LB: loop body
LE: loop exit
PB: predicated region body
PF: predicated region fallthrough
CT: control target
= control target key end

     0   :  { %7 = vsyncpa [#allocation3], 0  ;;  %s518_s9 = smov [#allocation2]   ;;  %s686_s0 = inlined_call_operand.vmem [shape: f32[8,2], index: 0, kind: input, shape index: {}]   ;;  %s687_s1 = inlined_call_operand.hbm [shape: f32[128,128], index: 1, kind: input, shape index: {}]   ;;  %s688_s2 = inlined_call_operand.vmem [shape: f32[24,128], index: 2, kind: output, shape index: {}]  }
   0x1   :  { %s15_s10 = sshll.u32 %s518_s9, 4  ;;  %s494_s13 = scalar_lea.hbm %s687_s1, 2048  ;;  %s16_s10 = int_to_ptr.vmem [resolvable:$true] %s15_s10 }
   0x2   :  { %p495_p0 = scmp.ne.s32.totalorder %s687_s1, %s494_s13  ;;  %p498_p1 = scmp.lt.u32.totalorder %s494_s13, %s687_s1 }
   0x4   :  { %p500_p2 = pnand %p498_p1, %p495_p0 }
   0x6   :  { %503 = shalt.err (!%p500_p2)
}
   0x7   :  { %s504_s18 = scalar_lea.vmem %s16_s10, 2048  ;;  %p509_p4 = scmp.lt.s32.totalorder %s16_s10, %s16_s10 }
   0x8   :  { %p505_p3 = scmp.ne.s32.totalorder %s16_s10, %s504_s18  ;;  %p510_p5 = scmp.lt.s32.totalorder %s504_s18, %s504_s18 }
   0xa   :  { %p511_p6 = por %p510_p5, %p509_p4 }
   0xc   :  { %p512_p7 = pnand %p511_p6, %p505_p3 }
   0xe   :  { %515 = shalt.err (!%p512_p7)
}
   0xf   :  { %s519_s19 = smov 128   ;;  %s520_s20 = smov 8  }
  0x10   :  { %21 = dma.hbm_to_vmem [thread:$0]  %s687_s1, 2048, %s16_s10, [#allocation3], %s519_s19, %s519_s19, %s520_s20  }
  0x11   :  { %516 = dma.done.wait [#allocation3], 2048  }
  0x12   :  { %517 = vsyncadd [#allocation3], 4294965248  ;;  %v521_v0 = vmov 0   ;;  %v25_v1 = vld [vmem:[%s686_s0] sm:$0xff]  ;;  %v522_v23 = vmov 1   ;;  %v265_v59 = vld [vmem:[#allocation2 + $0x8] sm:$0xff] }
  0x13   :  { %482 = vset.pattern.permute.xlu0 %v521_v0  ;;  %483 = vset.pattern.permute.xlu1 %v521_v0  ;;  %v26_v2 = vmul.f32 12.0, %v25_v1  ;;  %v264_v58 = vld [vmem:[#allocation2] sm:$0xff]  ;;  %v523_v63 = vmov 0.0|0.0   ;;  %vm524_vm0 = vmmov 0  }
  0x14   :  { %v433_v60 = vpack.c.bf16 %v265_v59, %v264_v58  ;;  %456 = vmatprep.subr.bf16.mxu1 %v523_v63  ;;  %432 = vmatprep.subr.bf16.mxu0 %v523_v63 }
  0x15   :  { %v28_v3 = vmul.f32 0.33333334, %v26_v2 }
  0x16   :  { %464 = vmatpush3.bf16.msra.mxu1 %v433_v60  ;;  %434 = vmatpush3.bf16.msra.mxu0 %v433_v60 }
  0x17   :  { %v29_v4 = vfloor.f32 %v28_v3  ;;  %457 = vmatprep.subr.bf16.mxu1 %v523_v63  ;;  %v267_v3 = vld [vmem:[#allocation2 + $0x18] sm:$0xff]  ;;  %435 = vmatprep.subr.bf16.mxu0 %v523_v63 }
  0x19   :  { %v30_v5 = vmax.f32 %v29_v4, 0.0 }
  0x1b   :  { %v31_v6 = vmin.f32 %v30_v5, 3.0 }
  0x1d   :  { %v32_v7 = vmul.f32 3.0, %v31_v6 }
  0x1f   :  { %v472_v8 = vtrunc.f32 %v32_v7  ;;  %v33_v9 = vsub.f32 %v26_v2, %v32_v7  ;;  %v266_v2 = vld [vmem:[#allocation2 + $0x10] sm:$0xff]  ;;  %v268_v7 = vld [vmem:[#allocation2 + $0x20] sm:$0xff] }
  0x20   :  { %v436_v4 = vpack.c.bf16 %v267_v3, %v266_v2 }
  0x21   :  { %v558_v10 = vcvt.f32.s32 %v472_v8  ;;  %v34_v11 = vmul.f32 0.6666667, %v33_v9  ;;  %v269_v8 = vld [vmem:[#allocation2 + $0x28] sm:$0xff] }
  0x22   :  { %465 = vmatpush3.bf16.msra.mxu1 %v436_v4  ;;  %v439_v9 = vpack.c.bf16 %v269_v8, %v268_v7  ;;  %437 = vmatpush3.bf16.msra.mxu0 %v436_v4 }
  0x23   :  { %88 = vperm.xlu0 %482, %v558_v10   ;;  %v561_v12 = vadd.f32 -1.0, %v34_v11  ;;  %v109_v13 = vadd.s32 1, %v558_v10  ;;  %v132_v14 = vadd.s32 2, %v558_v10  ;;  %v198_v16 = vadd.s32 14, %v558_v10  ;;  %458 = vmatprep.subr.bf16.mxu1 %v523_v63 }
  0x24   :  { %v155_v19 = vadd.s32 3, %v558_v10  ;;  %v178_v31 = vadd.s32 13, %v558_v10  ;;  %v218_v1 = vadd.s32 15, %v558_v10  ;;  %438 = vmatprep.subr.bf16.mxu0 %v523_v63 }
  0x25   :  { %111 = vperm.xlu1 %483, %v109_v13   ;;  %v61_v15 = vmul.f32 -13.5, %v561_v12  ;;  %v43_v17 = vmul.f32 1.6875, %v561_v12  ;;  %v55_v18 = vmul.f32 0.5625, %v561_v12  ;;  %v77_v20 = vmul.f32 -216.0, %v561_v12 }
  0x26   :  { %v65_v21 = vmul.f32 40.5, %v561_v12  ;;  %v79_v28 = vmul.f32 648.0, %v561_v12  ;;  %v69_v30 = vmul.f32 -40.5, %v561_v12  ;;  %v73_v38 = vmul.f32 13.5, %v561_v12  ;;  %466 = vmatpush3.bf16.msra.mxu1 %v439_v9  ;;  %440 = vmatpush3.bf16.msra.mxu0 %v439_v9 }
  0x27   :  { %134 = vperm.xlu0 %482, %v132_v14   ;;  %v44_v22 = vadd.f32 -0.5625, %v43_v17  ;;  %v62_v24 = vadd.f32 9.0, %v61_v15  ;;  %v56_v25 = vadd.f32 0.5625, %v55_v18  ;;  %v574_v27 = vadd.f32 72.0, %v77_v20  ;;  %459 = vmatprep.subr.bf16.mxu1 %v523_v63  ;;  %v270_v14 = vld [vmem:[#allocation2 + $0x30] sm:$0xff]  ;;  %v271_v15 = vld [vmem:[#allocation2 + $0x38] sm:$0xff] }
  0x28   :  { %v66_v29 = vadd.f32 -9.0, %v65_v21  ;;  %v584_v35 = vadd.f32 -72.0, %v79_v28  ;;  %v70_v37 = vadd.f32 -9.0, %v69_v30  ;;  %v37_v42 = vmul.f32 -0.5625, %v561_v12  ;;  %v272_v18 = vld [vmem:[#allocation2 + $0x40] sm:$0xff]  ;;  %441 = vmatprep.subr.bf16.mxu0 %v523_v63  ;;  %v277_v30 = vld [vmem:[#allocation2 + $0x68] sm:$0xff] }
  0x29   :  { %485 = vset.pattern.permute.xlu1 %v522_v23  ;;  %v45_v26 = vmul.f32 %v561_v12, %v44_v22  ;;  %v63_v32 = vmul.f32 %v561_v12, %v62_v24  ;;  %v57_v34 = vmul.f32 %v561_v12, %v56_v25  ;;  %v74_v45 = vadd.f32 9.0, %v73_v38  ;;  %v274_v24 = vld [vmem:[#allocation2 + $0x50] sm:$0xff]  ;;  %v275_v25 = vld [vmem:[#allocation2 + $0x58] sm:$0xff] }
  0x2a   :  { %200 = vperm.xlu1 %485, %v198_v16   ;;  %v67_v36 = vmul.f32 %v561_v12, %v66_v29  ;;  %v71_v44 = vmul.f32 %v561_v12, %v70_v37  ;;  %v38_v48 = vadd.f32 0.5625, %v37_v42  ;;  %v49_v49 = vmul.f32 -1.6875, %v561_v12  ;;  %v276_v29 = vld [vmem:[#allocation2 + $0x60] sm:$0xff] }
  0x2b   :  { %157 = vperm.xlu0 %482, %v155_v19   ;;  %v46_v33 = vadd.f32 -1.6875, %v45_v26  ;;  %v64_v39 = vadd.f32 0.5, %v63_v32  ;;  %v58_v41 = vadd.f32 -0.0625, %v57_v34  ;;  %v75_v51 = vmul.f32 %v561_v12, %v74_v45  ;;  %v273_v19 = vld [vmem:[#allocation2 + $0x48] sm:$0xff] }
  0x2c   :  { %v68_v43 = vadd.f32 -13.5, %v67_v36  ;;  %v72_v50 = vadd.f32 13.5, %v71_v44  ;;  %v39_v53 = vmul.f32 %v561_v12, %v38_v48  ;;  %v50_v54 = vadd.f32 -0.5625, %v49_v49 }
  0x2d   :  { %v47_v40 = vmul.f32 %v561_v12, %v46_v33  ;;  %v59_v47 = vmul.f32 %v561_v12, %v58_v41  ;;  %v602_v55 = vadd.f32 -0.5, %v75_v51  ;;  %v81_v13 = vmul.f32 -648.0, %v561_v12 }
  0x2e   :  { %486 = vset.pattern.permute.xlu1 %v521_v0  ;;  %v40_v56 = vadd.f32 0.0625, %v39_v53  ;;  %v51_v57 = vmul.f32 %v561_v12, %v50_v54  ;;  %v442_v16 = vpack.c.bf16 %v271_v15, %v270_v14  ;;  %v445_v20 = vpack.c.bf16 %v273_v19, %v272_v18 }
  0x2f   :  { %484 = vset.pattern.permute.xlu0 %v522_v23  ;;  %105 = vperm.xlu1 %486, %v574_v27   ;;  %v593_v46 = vadd.f32 0.5625, %v47_v40  ;;  %v599_v52 = vadd.f32 -0.0625, %v59_v47  ;;  %v82_v17 = vadd.f32 -72.0, %v81_v13  ;;  %v238_v21 = vadd.s32 16, %v558_v10 }
  0x30   :  { %180 = vperm.xlu0 %484, %v178_v31   ;;  %v41_v61 = vmul.f32 %v561_v12, %v40_v56  ;;  %v52_v62 = vadd.f32 1.6875, %v51_v57  ;;  %467 = vmatpush3.bf16.msra.mxu1 %v442_v16  ;;  %v83_v22 = vmul.f32 216.0, %v561_v12  ;;  %v448_v26 = vpack.c.bf16 %v275_v25, %v274_v24  ;;  %v279_v31 = vld [vmem:[#allocation2 + $0x78] sm:$0xff] }
  0x31   :  { %460 = vmatprep.subr.bf16.mxu1 %v523_v63  ;;  %443 = vmatpush3.bf16.msra.mxu0 %v442_v16  ;;  %v451_v10 = vpack.c.bf16 %v277_v30, %v276_v29  ;;  %v525_v33 = vmov 0.0  }
  0x32   :  { %v42_v5 = vadd.f32 -0.0625, %v41_v61  ;;  %v53_v6 = vmul.f32 %v561_v12, %v52_v62  ;;  %444 = vmatprep.subr.bf16.mxu0 %v523_v63  ;;  %v84_v28 = vadd.f32 72.0, %v83_v22  ;;  %v278_v12 = vld [vmem:[#allocation2 + $0x70] sm:$0xff]  ;;  %426 = vmatprep.mubr.msk.f32.mxu1 %vm524_vm0, %v525_v33 }
  0x33   :  { %128 = vperm.xlu1 %486, %v584_v35   ;;  %v454_v32 = vpack.c.bf16 %v279_v31, %v278_v12  ;;  %423 = vmatprep.mubr.msk.f32.mxu0 %vm524_vm0, %v525_v33 }
  0x34   :  { %487 = vset.pattern.permute.xlu0 %v521_v0  ;;  %v618_v11 = vadd.f32 0.5625, %v53_v6  ;;  %468 = vmatpush3.bf16.msra.mxu1 %v445_v20 }
  0x35   :  { %99 = vperm.xlu0 %487, %v64_v39   ;;  %461 = vmatprep.subr.bf16.mxu1 %v523_v63 }
  0x36   :  { %446 = vmatpush3.bf16.msra.mxu0 %v445_v20 }
  0x37   :  { %122 = vperm.xlu1 %486, %v68_v43   ;;  %447 = vmatprep.subr.bf16.mxu0 %v523_v63 }
  0x38   :  { %469 = vmatpush3.bf16.msra.mxu1 %v448_v26 }
  0x39   :  { %116 = vperm.xlu0 %487, %v593_v46   ;;  %462 = vmatprep.subr.bf16.mxu1 %v523_v63 }
  0x3a   :  { %449 = vmatpush3.bf16.msra.mxu0 %v448_v26 }
  0x3b   :  { %145 = vperm.xlu1 %486, %v72_v50   ;;  %450 = vmatprep.subr.bf16.mxu0 %v523_v63 }
  0x3c   :  { %470 = vmatpush3.bf16.msra.mxu1 %v451_v10 }
  0x3d   :  { %162 = vperm.xlu0 %487, %v599_v52   ;;  %463 = vmatprep.subr.bf16.mxu1 %v523_v63 }
  0x3e   :  { %452 = vmatpush3.bf16.msra.mxu0 %v451_v10 }
  0x3f   :  { %168 = vperm.xlu1 %486, %v602_v55   ;;  %453 = vmatprep.subr.bf16.mxu0 %v523_v63 }
  0x40   :  { %471 = vmatpush3.bf16.msra.mxu1 %v454_v32 }
  0x41   :  { %491 = vset.pattern.permute.xlu0 %v522_v23 }
  0x42   :  { %189 = vperm.xlu0 %491, %v64_v39   ;;  %455 = vmatpush3.bf16.msra.mxu0 %v454_v32 }
  0x43   :  { %488 = vset.pattern.permute.xlu1 %v522_v23 }
  0x44   :  { %209 = vperm.xlu1 %488, %v68_v43  }
  0x46   :  { %220 = vperm.xlu0 %491, %v218_v1  }
  0x48   :  { %489 = vset.pattern.permute.xlu1 %v521_v0 }
  0x49   :  { %93 = vperm.xlu1 %489, %v42_v5  }
  0x4a   :  { %229 = vperm.xlu0 %491, %v72_v50   ;;  %v85_v50 = vlaneseq }
  0x4c   :  { %v86_v53 = vand.u32 127, %v85_v50 }
  0x4d   :  { %139 = vperm.xlu1 %489, %v618_v11  }
  0x4e   :  { %184 = vperm.xlu0 %491, %v42_v5  }
  0x51   :  { %151 = vperm.xlu1 %489, %v82_v17  }
  0x52   :  { %214 = vperm.xlu0 %491, %v584_v35  }
  0x55   :  { %490 = vset.pattern.permute.xlu1 %v522_v23 }
  0x56   :  { %234 = vperm.xlu0 %491, %v82_v17   ;;  %240 = vperm.xlu1 %490, %v238_v21  }
  0x5a   :  { %254 = vperm.xlu0 %491, %v84_v28   ;;  %492 = vset.pattern.permute.xlu1 %v521_v0 }
  0x5b   :  { %174 = vperm.xlu1 %492, %v84_v28  }
  0x5f   :  { %493 = vset.pattern.permute.xlu1 %v522_v23 }
  0x60   :  { %249 = vperm.xlu1 %493, %v602_v55  }
  0x64   :  { %194 = vperm.xlu1 %493, %v574_v27  }
  0x68   :  { %204 = vperm.xlu1 %493, %v593_v46  }
  0x6c   :  { %224 = vperm.xlu1 %493, %v618_v11  }
  0x70   :  { %244 = vperm.xlu1 %493, %v599_v52  }
  0xa2   :  { %v89_v0 = vpop.permute.xlu0 %88 }
  0xa3   :  { %vm90_vm1 = vcmp.eq.s32.totalorder %v86_v53, %v89_v0 }
  0xa4   :  { %v112_v23 = vpop.permute.xlu1 %111 }
  0xa5   :  { %vm113_vm3 = vcmp.eq.s32.totalorder %v86_v53, %v112_v23 }
  0xa6   :  { %v135_v34 = vpop.permute.xlu0 %134 }
  0xa7   :  { %vm136_vm2 = vcmp.eq.s32.totalorder %v86_v53, %v135_v34 }
  0xa9   :  { %v646_v35 = vpop.permute.xlu1 %200 }
  0xaa   :  { %v158_v36 = vpop.permute.xlu0 %157  ;;  %vm202_vm7 = vcmp.eq.s32.totalorder %v86_v53, %v646_v35 }
  0xab   :  { %vm159_vm5 = vcmp.eq.s32.totalorder %v86_v53, %v158_v36 }
  0xae   :  { %v106_v37 = vpop.permute.xlu1 %105 }
  0xaf   :  { %v181_v38 = vpop.permute.xlu0 %180  ;;  %v108_v3 = vsel %vm90_vm1, %v106_v37, 0.0 }
  0xb0   :  { %vm182_vm4 = vcmp.eq.s32.totalorder %v86_v53, %v181_v38 }
  0xb2   :  { %v129_v39 = vpop.permute.xlu1 %128 }
  0xb3   :  { %v131_v6 = vsel %vm113_vm3, %v129_v39, %v108_v3 }
  0xb4   :  { %v100_v40 = vpop.permute.xlu0 %99 }
  0xb5   :  { %v102_v55 = vsel %vm90_vm1, %v100_v40, 0.0 }
  0xb6   :  { %v123_v41 = vpop.permute.xlu1 %122 }
  0xb7   :  { %v125_v57 = vsel %vm113_vm3, %v123_v41, %v102_v55 }
  0xb8   :  { %v117_v42 = vpop.permute.xlu0 %116 }
  0xba   :  { %v146_v43 = vpop.permute.xlu1 %145 }
  0xbb   :  { %v148_v58 = vsel %vm136_vm2, %v146_v43, %v125_v57 }
  0xbc   :  { %v163_v27 = vpop.permute.xlu0 %162 }
  0xbe   :  { %v169_v44 = vpop.permute.xlu1 %168 }
  0xbf   :  { %v171_v59 = vsel %vm159_vm5, %v169_v44, %v148_v58 }
  0xc1   :  { %v190_v45 = vpop.permute.xlu0 %189 }
  0xc2   :  { %v192_v62 = vsel %vm182_vm4, %v190_v45, %v171_v59 }
  0xc3   :  { %v210_v46 = vpop.permute.xlu1 %209 }
  0xc4   :  { %v212_v63 = vsel %vm202_vm7, %v210_v46, %v192_v62 }
  0xc5   :  { %v221_v47 = vpop.permute.xlu0 %220 }
  0xc6   :  { %vm222_vm6 = vcmp.eq.s32.totalorder %v86_v53, %v221_v47 }
  0xc8   :  { %v94_v48 = vpop.permute.xlu1 %93 }
  0xc9   :  { %v230_v51 = vpop.permute.xlu0 %229  ;;  %v96_v8 = vsel %vm90_vm1, %v94_v48, 0.0 }
  0xca   :  { %v232_v1 = vsel %vm222_vm6, %v230_v51, %v212_v63  ;;  %v119_v15 = vsel %vm113_vm3, %v117_v42, %v96_v8 }
  0xcc   :  { %v140_v49 = vpop.permute.xlu1 %139 }
  0xcd   :  { %v185_v54 = vpop.permute.xlu0 %184  ;;  %v142_v18 = vsel %vm136_vm2, %v140_v49, %v119_v15 }
  0xce   :  { %v165_v21 = vsel %vm159_vm5, %v163_v27, %v142_v18 }
  0xcf   :  { %v187_v24 = vsel %vm182_vm4, %v185_v54, %v165_v21 }
  0xd0   :  { %v152_v52 = vpop.permute.xlu1 %151 }
  0xd1   :  { %v215_v60 = vpop.permute.xlu0 %214  ;;  %v154_v7 = vsel %vm136_vm2, %v152_v52, %v131_v6 }
  0xd5   :  { %v241_v56 = vpop.permute.xlu1 %240  ;;  %v235_v4 = vpop.permute.xlu0 %234 }
  0xd6   :  { %vm242_vm8 = vcmp.eq.s32.totalorder %v86_v53, %v241_v56 }
  0xd9   :  { %v255_v16 = vpop.permute.xlu0 %254 }
  0xda   :  { %v175_v61 = vpop.permute.xlu1 %174 }
  0xdb   :  { %v177_v9 = vsel %vm159_vm5, %v175_v61, %v154_v7 }
  0xdf   :  { %v250_v2 = vpop.permute.xlu1 %249 }
  0xe0   :  { %v252_v5 = vsel %vm242_vm8, %v250_v2, %v232_v1 }
  0xe1   :  { %427 = vmatmul.mubr.f32.vlgmr.msra.gmra.mrb[0].mxu1 %v252_v5 }
  0xe2   :  { %429 = vmatprep.mubr.msk.f32.mxu1 %vm524_vm0, %v525_v33 }
  0xe3   :  { %v195_v11 = vpop.permute.xlu1 %194 }
  0xe4   :  { %v197_v13 = vsel %vm182_vm4, %v195_v11, %v177_v9 }
  0xe5   :  { %v217_v14 = vsel %vm202_vm7, %v215_v60, %v197_v13 }
  0xe6   :  { %v237_v17 = vsel %vm222_vm6, %v235_v4, %v217_v14 }
  0xe7   :  { %v257_v19 = vsel %vm242_vm8, %v255_v16, %v237_v17  ;;  %v205_v20 = vpop.permute.xlu1 %204 }
  0xe8   :  { %430 = vmatmul.mubr.f32.gmra.mrb[2].mxu1 %v257_v19  ;;  %v207_v25 = vsel %vm202_vm7, %v205_v20, %v187_v24 }
  0xeb   :  { %v225_v22 = vpop.permute.xlu1 %224 }
  0xec   :  { %v227_v26 = vsel %vm222_vm6, %v225_v22, %v207_v25 }
  0xef   :  { %v245_v28 = vpop.permute.xlu1 %244 }
  0xf0   :  { %v247_v29 = vsel %vm242_vm8, %v245_v28, %v227_v26 }
  0xf1   :  { %424 = vmatmul.mubr.f32.vlgmr.msra.gmra.mrb[0].mxu0 %v247_v29 }
 0x1b4   :  { %v351_v30 = vpop.f32.mrb[0].mxu1 }
 0x1b5   :  { %v361_v10 = vadd.f32 %v351_v30, %v252_v5  ;;  %v428_v12 = vpop.f32.mrb[1].mxu1 }
 0x1b7   :  { %364 = vst [vmem:[%s688_s2 + $0x8] sm:$0xff] %v361_v10 }
 0x1bb   :  { %v356_v31 = vpop.f32.mrb[2].mxu1 }
 0x1bc   :  { %v362_v32 = vadd.f32 %v356_v31, %v257_v19  ;;  %v431_v33 = vpop.f32.mrb[3].mxu1 }
 0x1be   :  { %365 = vst [vmem:[%s688_s2 + $0x10] sm:$0xff] %v362_v32 }
 0x1c4   :  { %v346_v0 = vpop.f32.mrb[0].mxu0 }
 0x1c5   :  { %v360_v23 = vadd.f32 %v346_v0, %v247_v29  ;;  %v425_v34 = vpop.f32.mrb[1].mxu0 }
 0x1c7   :  { %363 = vst [vmem:[%s688_s2] sm:$0xff] %v360_v23 }
 0x1c8   :  { %370 = vsyncpa [#allocation3], 1 }

</bundles_post_ra>
